<compile_context>
chip_gen: v7x
topology: tpu7x:2x2x1
jax: 0.10.0
libtpu: 0.0.40
codegen_flags: <defaults>
</compile_context>

<pallas_src>
import jax
import jax.numpy as jnp
from jax.experimental import pallas as pl
from jax.experimental.pallas import tpu as pltpu

_LANES = 128
_GRANULE = 8 * _LANES  # one full (8,128) f32 vreg of batch elements


def _round_up(x, m):
    return ((x + m - 1) // m) * m


def _cdiv(a, b):
    return -(-a // b)


def mlp_kernel(params_ref, x_ref, o_ref):
    """Fused MLP on a dense (sublane x lane) batch tile.

    x_ref: (3, tile_rows, 128) f32 -- features on the leading axis, batch dense
           across sublanes and lanes.
    o_ref: (2, tile_rows, 128) f32.
    params_ref: SMEM f32[14], packed as
      [0:6]   w1 (in=3, out=2) row-major -> w1[k, j] = p[2*k + j]
      [6:8]   b1
      [8:12]  w2 (in=2, out=2) row-major -> w2[k, j] = p[8 + 2*k + j]
      [12:14] b2
    """
    p = params_ref
    # Read the 14 scalars once, up front (hoisted scalar->vreg broadcasts).
    w1_00, w1_01 = p[0], p[1]
    w1_10, w1_11 = p[2], p[3]
    w1_20, w1_21 = p[4], p[5]
    b1_0, b1_1 = p[6], p[7]
    w2_00, w2_01 = p[8], p[9]
    w2_10, w2_11 = p[10], p[11]
    b2_0, b2_1 = p[12], p[13]

    x0 = x_ref[0]            # (tile_rows, 128), fully dense vregs
    x1 = x_ref[1]
    x2 = x_ref[2]

    # Hidden layer + ReLU: pure VPU scalar-broadcast FMAs (no MXU).
    h0 = jnp.maximum(w1_00 * x0 + w1_10 * x1 + w1_20 * x2 + b1_0, 0.0)
    h1 = jnp.maximum(w1_01 * x0 + w1_11 * x1 + w1_21 * x2 + b1_1, 0.0)

    # Output layer.
    o_ref[0] = (w2_00 * h0 + w2_10 * h1 + b2_0).astype(o_ref.dtype)
    o_ref[1] = (w2_01 * h0 + w2_11 * h1 + b2_1).astype(o_ref.dtype)


def net_3_2_forward(x, w1, b1, w2, b2, *, max_tile_b=256 * 1024):
    """Fused forward pass. x: (B, 3) f32; returns (B, 2) f32.

    Weights are stored (in_features, out_features) so the math is x @ W,
    matching PyTorch's y = x @ W.T with W of shape (out, in).
    """
    B = x.shape[0]

    # --- tiling: dense (rows, 128) layout, bounded padding waste ------------
    b_granule = _round_up(max(B, _GRANULE), _GRANULE)      # multiple of 1024
    rows_total = b_granule // _LANES                        # multiple of 8
    max_rows = max(max_tile_b // _LANES, 8)                 # cap per-tile VMEM

    num_tiles = max(_cdiv(rows_total, max_rows), 1)
    if rows_total >= 16 and num_tiles < 2:
        num_tiles = 2   # let v7x shard >=2 tiles across its two TensorCores

    tile_rows = _round_up(_cdiv(rows_total, num_tiles), 8)  # multiple of 8
    rows_pad = tile_rows * num_tiles
    b_pad = rows_pad * _LANES

    # --- layout: channels-major, batch dense in (sublanes, lanes) -----------
    xt = jnp.transpose(x).astype(jnp.float32)               # (3, B)
    if b_pad != B:
        xt = jnp.pad(xt, ((0, 0), (0, b_pad - B)))
    x3 = xt.reshape(3, rows_pad, _LANES)                    # free, contiguous

    # Pack all 14 parameters into one small SMEM-resident buffer.
    params = jnp.concatenate(
        [w1.reshape(-1), b1.reshape(-1), w2.reshape(-1), b2.reshape(-1)]
    ).astype(jnp.float32)                                    # f32[14]

    # Double-buffered (in + out) blocks plus slack; stays < 16 MiB (v5e) with
    # the default 256K-lane tile and far under v6e/v7x scoped limits.
    block_bytes = (3 + 2) * tile_rows * _LANES * 4
    vmem_limit = max(2 * block_bytes + (1 << 20), 4 << 20)

    out3 = pl.pallas_call(
        mlp_kernel,
        out_shape=jax.ShapeDtypeStruct((2, rows_pad, _LANES), jnp.float32),
        grid=(num_tiles,),
        in_specs=[
            # Scalars stay resident in SMEM across all grid steps.
            pl.BlockSpec(memory_space=pltpu.MemorySpace.SMEM),
            # Dense batch tiles; (tile_rows, 128) satisfies the (8,128) rule.
            pl.BlockSpec((3, tile_rows, _LANES), lambda i: (0, i, 0)),
        ],
        out_specs=pl.BlockSpec((2, tile_rows, _LANES), lambda i: (0, i, 0)),
        compiler_params=pltpu.CompilerParams(
            dimension_semantics=("parallel",),   # shard tiles across TCs on v7x
            vmem_limit_bytes=int(vmem_limit),
        ),
    )(params, x3)

    out_t = out3.reshape(2, b_pad)[:, :B]                    # (2, B)
    return jnp.transpose(out_t)                              # (B, 2)


def init_params(key):
    """Deterministic init mirroring PyTorch nn.Linear default:
    U(-1/sqrt(fan_in), 1/sqrt(fan_in)) for both weight and bias."""
    k1, k2, k3, k4 = jax.random.split(key, 4)
    bound1 = 1.0 / jnp.sqrt(3.0)   # fc1: in_features = 3
    bound2 = 1.0 / jnp.sqrt(2.0)   # fc2: in_features = 2
    # Weights stored transposed to (in, out) so forward is x @ W.
    w1 = jax.random.uniform(k1, (3, 2), jnp.float32, -bound1, bound1)
    b1 = jax.random.uniform(k2, (2,), jnp.float32, -bound1, bound1)
    w2 = jax.random.uniform(k3, (2, 2), jnp.float32, -bound2, bound2)
    b2 = jax.random.uniform(k4, (2,), jnp.float32, -bound2, bound2)
    return w1, b1, w2, b2


if __name__ == "__main__":
    key = jax.random.PRNGKey(0)
    k_x, k_p = jax.random.split(key)

    B = 8
    x = jax.random.normal(k_x, (B, 3), jnp.float32)
    w1, b1, w2, b2 = init_params(k_p)

    out = jax.block_until_ready(net_3_2_forward(x, w1, b1, w2, b2))

    # Reference check in plain JAX.
    h_ref = jnp.maximum(x @ w1 + b1, 0.0)
    out_ref = h_ref @ w2 + b2
    assert out.shape == (B, 2)
    assert jnp.allclose(out, out_ref, atol=1e-5, rtol=1e-5)

    print("KERNEL_OK")
</pallas_src>

<mosaic_0001>
module attributes {stable_mosaic.version = 11 : i64} {
  func.func @mlp_kernel(%arg0: i32, %arg1: memref<14xf32, #tpu.memory_space<smem>>, %arg2: memref<3x8x128xf32, #tpu.memory_space<vmem>>, %arg3: memref<2x8x128xf32, #tpu.memory_space<vmem>>) attributes {dimension_semantics = [#tpu.dimension_semantics<parallel>], iteration_bounds = array<i64: 1>, scalar_prefetch = 0 : i64, scratch_operands = 0 : i64, tpu.core_type = #tpu.core_type<tc>, window_params = [{transform_indices = @transform_0, window_bounds = array<i64: 14>}, {transform_indices = @transform_1, window_bounds = array<i64: 3, 8, 128>}, {transform_indices = @transform_2, window_bounds = array<i64: 2, 8, 128>}]} {
    %c0 = arith.constant 0 : index
    %0 = memref.load %arg1[%c0] : memref<14xf32, #tpu.memory_space<smem>>
    %c1 = arith.constant 1 : index
    %1 = memref.load %arg1[%c1] : memref<14xf32, #tpu.memory_space<smem>>
    %c2 = arith.constant 2 : index
    %2 = memref.load %arg1[%c2] : memref<14xf32, #tpu.memory_space<smem>>
    %c3 = arith.constant 3 : index
    %3 = memref.load %arg1[%c3] : memref<14xf32, #tpu.memory_space<smem>>
    %c4 = arith.constant 4 : index
    %4 = memref.load %arg1[%c4] : memref<14xf32, #tpu.memory_space<smem>>
    %c5 = arith.constant 5 : index
    %5 = memref.load %arg1[%c5] : memref<14xf32, #tpu.memory_space<smem>>
    %c6 = arith.constant 6 : index
    %6 = memref.load %arg1[%c6] : memref<14xf32, #tpu.memory_space<smem>>
    %c7 = arith.constant 7 : index
    %7 = memref.load %arg1[%c7] : memref<14xf32, #tpu.memory_space<smem>>
    %c8 = arith.constant 8 : index
    %8 = memref.load %arg1[%c8] : memref<14xf32, #tpu.memory_space<smem>>
    %c9 = arith.constant 9 : index
    %9 = memref.load %arg1[%c9] : memref<14xf32, #tpu.memory_space<smem>>
    %c10 = arith.constant 10 : index
    %10 = memref.load %arg1[%c10] : memref<14xf32, #tpu.memory_space<smem>>
    %c11 = arith.constant 11 : index
    %11 = memref.load %arg1[%c11] : memref<14xf32, #tpu.memory_space<smem>>
    %c12 = arith.constant 12 : index
    %12 = memref.load %arg1[%c12] : memref<14xf32, #tpu.memory_space<smem>>
    %c13 = arith.constant 13 : index
    %13 = memref.load %arg1[%c13] : memref<14xf32, #tpu.memory_space<smem>>
    %c0_0 = arith.constant 0 : index
    %c0_1 = arith.constant 0 : index
    %c0_2 = arith.constant 0 : index
    %14 = vector.load %arg2[%c0_0, %c0_1, %c0_2] : memref<3x8x128xf32, #tpu.memory_space<vmem>>, vector<1x8x128xf32>
    %15 = vector.shape_cast %14 : vector<1x8x128xf32> to vector<8x128xf32>
    %c1_3 = arith.constant 1 : index
    %c0_4 = arith.constant 0 : index
    %c0_5 = arith.constant 0 : index
    %16 = vector.load %arg2[%c1_3, %c0_4, %c0_5] : memref<3x8x128xf32, #tpu.memory_space<vmem>>, vector<1x8x128xf32>
    %17 = vector.shape_cast %16 : vector<1x8x128xf32> to vector<8x128xf32>
    %c2_6 = arith.constant 2 : index
    %c0_7 = arith.constant 0 : index
    %c0_8 = arith.constant 0 : index
    %18 = vector.load %arg2[%c2_6, %c0_7, %c0_8] : memref<3x8x128xf32, #tpu.memory_space<vmem>>, vector<1x8x128xf32>
    %19 = vector.shape_cast %18 : vector<1x8x128xf32> to vector<8x128xf32>
    %20 = vector.broadcast %0 : f32 to vector<8x128xf32>
    %21 = arith.mulf %20, %15 : vector<8x128xf32>
    %22 = vector.broadcast %2 : f32 to vector<8x128xf32>
    %23 = arith.mulf %22, %17 : vector<8x128xf32>
    %24 = arith.addf %21, %23 : vector<8x128xf32>
    %25 = vector.broadcast %4 : f32 to vector<8x128xf32>
    %26 = arith.mulf %25, %19 : vector<8x128xf32>
    %27 = arith.addf %24, %26 : vector<8x128xf32>
    %28 = vector.broadcast %6 : f32 to vector<8x128xf32>
    %29 = arith.addf %27, %28 : vector<8x128xf32>
    %cst = arith.constant 0.000000e+00 : f32
    %30 = vector.broadcast %cst : f32 to vector<8x128xf32>
    %31 = arith.maximumf %29, %30 : vector<8x128xf32>
    %32 = vector.broadcast %1 : f32 to vector<8x128xf32>
    %33 = arith.mulf %32, %15 : vector<8x128xf32>
    %34 = vector.broadcast %3 : f32 to vector<8x128xf32>
    %35 = arith.mulf %34, %17 : vector<8x128xf32>
    %36 = arith.addf %33, %35 : vector<8x128xf32>
    %37 = vector.broadcast %5 : f32 to vector<8x128xf32>
    %38 = arith.mulf %37, %19 : vector<8x128xf32>
    %39 = arith.addf %36, %38 : vector<8x128xf32>
    %40 = vector.broadcast %7 : f32 to vector<8x128xf32>
    %41 = arith.addf %39, %40 : vector<8x128xf32>
    %cst_9 = arith.constant 0.000000e+00 : f32
    %42 = vector.broadcast %cst_9 : f32 to vector<8x128xf32>
    %43 = arith.maximumf %41, %42 : vector<8x128xf32>
    %44 = vector.broadcast %8 : f32 to vector<8x128xf32>
    %45 = arith.mulf %44, %31 : vector<8x128xf32>
    %46 = vector.broadcast %10 : f32 to vector<8x128xf32>
    %47 = arith.mulf %46, %43 : vector<8x128xf32>
    %48 = arith.addf %45, %47 : vector<8x128xf32>
    %49 = vector.broadcast %12 : f32 to vector<8x128xf32>
    %50 = arith.addf %48, %49 : vector<8x128xf32>
    %c0_10 = arith.constant 0 : index
    %c0_11 = arith.constant 0 : index
    %c0_12 = arith.constant 0 : index
    %51 = vector.load %arg3[%c0_10, %c0_11, %c0_12] : memref<2x8x128xf32, #tpu.memory_space<vmem>>, vector<1x8x128xf32>
    %52 = vector.shape_cast %51 : vector<1x8x128xf32> to vector<8x128xf32>
    %53 = vector.shape_cast %50 : vector<8x128xf32> to vector<1x8x128xf32>
    tpu.vector_store %arg3[%c0_10, %c0_11, %c0_12], %53 {strides = array<i32>} : memref<2x8x128xf32, #tpu.memory_space<vmem>>, vector<1x8x128xf32>,
    %54 = vector.broadcast %9 : f32 to vector<8x128xf32>
    %55 = arith.mulf %54, %31 : vector<8x128xf32>
    %56 = vector.broadcast %11 : f32 to vector<8x128xf32>
    %57 = arith.mulf %56, %43 : vector<8x128xf32>
    %58 = arith.addf %55, %57 : vector<8x128xf32>
    %59 = vector.broadcast %13 : f32 to vector<8x128xf32>
    %60 = arith.addf %58, %59 : vector<8x128xf32>
    %c1_13 = arith.constant 1 : index
    %c0_14 = arith.constant 0 : index
    %c0_15 = arith.constant 0 : index
    %61 = vector.load %arg3[%c1_13, %c0_14, %c0_15] : memref<2x8x128xf32, #tpu.memory_space<vmem>>, vector<1x8x128xf32>
    %62 = vector.shape_cast %61 : vector<1x8x128xf32> to vector<8x128xf32>
    %63 = vector.shape_cast %60 : vector<8x128xf32> to vector<1x8x128xf32>
    tpu.vector_store %arg3[%c1_13, %c0_14, %c0_15], %63 {strides = array<i32>} : memref<2x8x128xf32, #tpu.memory_space<vmem>>, vector<1x8x128xf32>,
    return
  }
  func.func @transform_0(%arg0: i32) -> i32 {
    %c0_i32 = arith.constant 0 : i32
    %c0_i32_0 = arith.constant 0 : i32
    return %c0_i32 : i32
  }
  func.func @transform_1(%arg0: i32) -> (i32, i32, i32) {
    %c0_i32 = arith.constant 0 : i32
    %c0_i32_0 = arith.constant 0 : i32
    %c0_i32_1 = arith.constant 0 : i32
    return %c0_i32, %arg0, %c0_i32_0 : i32, i32, i32
  }
  func.func @transform_2(%arg0: i32) -> (i32, i32, i32) {
    %c0_i32 = arith.constant 0 : i32
    %c0_i32_0 = arith.constant 0 : i32
    %c0_i32_1 = arith.constant 0 : i32
    return %c0_i32, %arg0, %c0_i32_0 : i32, i32, i32
  }
}

</mosaic_0001>

<bundles_post_ra>
// kernel: tpu_custom_call.1
= control target key start
LH: loop header
LB: loop body
LE: loop exit
PB: predicated region body
PF: predicated region fallthrough
CT: control target
= control target key end

     0   :  { %7 = vsyncpa [#allocation5], 0  ;;  %s259_s0 = inlined_call_operand.hbm [shape: f32[14], index: 0, kind: input, shape index: {}]   ;;  %s260_s1 = inlined_call_operand.hbm [shape: f32[3,8,128], index: 1, kind: input, shape index: {}]   ;;  %s261_s2 = inlined_call_operand.hbm [shape: f32[2,8,128], index: 2, kind: output, shape index: {}]  }
   0x1   :  { %8 = vsyncpa [#allocation3], 0 }
   0x2   :  { %9 = vsyncpa [#allocation4], 0  ;;  %s131_s11 = scalar_lea.hbm %s259_s0, 16 }
   0x3   :  { %p132_p0 = scmp.ne.s32.totalorder %s259_s0, %s131_s11  ;;  %p135_p1 = scmp.lt.u32.totalorder %s131_s11, %s259_s0 }
   0x5   :  { %p137_p2 = pnand %p135_p1, %p132_p0 }
   0x7   :  { %140 = shalt.err (!%p137_p2)
}
   0x8   :  { %s191_s16 = smov [#allocation2]   ;;  %s192_s19 = smov [#allocation6]  }
   0x9   :  { %17 = dma.hbm_to_smem %s259_s0, 16, %s191_s16, [#allocation5]  }
   0xa   :  { %s23_s20 = sshll.u32 %s192_s19, 4  ;;  %s141_s23 = scalar_lea.hbm %s260_s1, 384  ;;  %s24_s20 = int_to_ptr.vmem [resolvable:$true] %s23_s20 }
   0xb   :  { %p142_p3 = scmp.ne.s32.totalorder %s260_s1, %s141_s23  ;;  %p145_p4 = scmp.lt.u32.totalorder %s141_s23, %s260_s1 }
   0xd   :  { %p147_p5 = pnand %p145_p4, %p142_p3 }
   0xf   :  { %150 = shalt.err (!%p147_p5)
}
  0x10   :  { %s151_s28 = scalar_lea.vmem %s24_s20, 384  ;;  %p156_p7 = scmp.lt.s32.totalorder %s24_s20, %s24_s20 }
  0x11   :  { %p152_p6 = scmp.ne.s32.totalorder %s24_s20, %s151_s28  ;;  %p157_p8 = scmp.lt.s32.totalorder %s151_s28, %s151_s28 }
  0x13   :  { %p158_p9 = por %p157_p8, %p156_p7 }
  0x15   :  { %p159_p10 = pnand %p158_p9, %p152_p6 }
  0x17   :  { %162 = shalt.err (!%p159_p10)
}
  0x18   :  { %s193_s0 = smov 128   ;;  %s194_s29 = smov 8  }
  0x19   :  { %29 = dma.hbm_to_vmem [thread:$0]  %s260_s1, 384, %s24_s20, [#allocation3], %s193_s0, %s193_s0, %s194_s29  }
  0x1a   :  { %185 = dma.done.wait [#allocation5], 16  }
  0x1b   :  { %186 = vsyncadd [#allocation5], 4294967280 }
  0x1c   :  { %187 = dma.done.wait [#allocation3], 384  }
  0x1d   :  { %188 = vsyncadd [#allocation3], 4294966912 }
  0x1e   :  { %36 = sfence }
  0x1f   :  { %s37_s4 = sld [smem:[#allocation2]]  ;;  %s113_s5 = sld [smem:[#allocation2 + $0x1]]  ;;  %v51_v0 = vld [vmem:[#allocation6] sm:$0xff]  ;;  %v53_v1 = vld [vmem:[#allocation6 + $0x8] sm:$0xff]  ;;  %v55_v2 = vld [vmem:[#allocation6 + $0x10] sm:$0xff] }
  0x20   :  { %s114_s6 = sld [smem:[#allocation2 + $0x2]]  ;;  %s115_s7 = sld [smem:[#allocation2 + $0x3]] }
  0x21   :  { %s116_s8 = sld [smem:[#allocation2 + $0x4]]  ;;  %s117_s9 = sld [smem:[#allocation2 + $0x5]] }
  0x22   :  { %s118_s10 = sld [smem:[#allocation2 + $0x6]]  ;;  %s119_s11 = sld [smem:[#allocation2 + $0x7]] }
  0x23   :  { %s238_s12 = sld [smem:[#allocation2 + $0x8]]  ;;  %s240_s13 = sld [smem:[#allocation2 + $0xa]] }
  0x24   :  { %s121_s1 = sld [smem:[#allocation2 + $0x9]]  ;;  %s123_s14 = sld [smem:[#allocation2 + $0xb]] }
  0x25   :  { %v56_v3 = vstv %s37_s4  ;;  %v67_v4 = vstv %s113_s5  ;;  %s124_s15 = sld [smem:[#allocation2 + $0xc]]  ;;  %s125_s16 = sld [smem:[#allocation2 + $0xd]] }
  0x26   :  { %v57_v5 = vmul.f32 %v56_v3, %v51_v0  ;;  %v58_v6 = vstv %s114_s6  ;;  %v68_v7 = vmul.f32 %v67_v4, %v51_v0  ;;  %v69_v8 = vstv %s115_s7  ;;  %s195_s17 = smov [#allocation7]  }
  0x27   :  { %v59_v9 = vmul.f32 %v58_v6, %v53_v1  ;;  %v61_v10 = vstv %s116_s8  ;;  %v70_v11 = vmul.f32 %v69_v8, %v53_v1  ;;  %v72_v12 = vstv %s117_s9  ;;  %s100_s18 = sshll.u32 %s195_s17, 4  ;;  %s101_s18 = int_to_ptr.vmem [resolvable:$true] %s100_s18 }
  0x28   :  { %v62_v13 = vmul.f32 %v61_v10, %v55_v2  ;;  %v73_v14 = vmul.f32 %v72_v12, %v55_v2  ;;  %v64_v17 = vstv %s118_s10  ;;  %v75_v18 = vstv %s119_s11  ;;  %s163_s19 = scalar_lea.vmem %s101_s18, 256  ;;  %p168_p12 = scmp.lt.s32.totalorder %s101_s18, %s101_s18 }
  0x29   :  { %v60_v15 = vadd.f32 %v59_v9, %v57_v5  ;;  %v71_v16 = vadd.f32 %v70_v11, %v68_v7  ;;  %v78_v23 = vstv %s238_s12  ;;  %v80_v24 = vstv %s240_s13  ;;  %p164_p11 = scmp.ne.s32.totalorder %s101_s18, %s163_s19  ;;  %p169_p13 = scmp.lt.s32.totalorder %s163_s19, %s163_s19 }
  0x2a   :  { %v86_v25 = vstv %s121_s1  ;;  %v88_v26 = vstv %s123_s14 }
  0x2b   :  { %v63_v19 = vadd.f32 %v62_v13, %v60_v15  ;;  %v74_v20 = vadd.f32 %v73_v14, %v71_v16  ;;  %v83_v33 = vstv %s124_s15  ;;  %v91_v34 = vstv %s125_s16  ;;  %p170_p0 = por %p169_p13, %p168_p12 }
  0x2d   :  { %v65_v21 = vadd.f32 %v64_v17, %v63_v19  ;;  %v76_v22 = vadd.f32 %v75_v18, %v74_v20  ;;  %p171_p1 = pnand %p170_p0, %p164_p11 }
  0x2f   :  { %v66_v27 = vmax.f32 %v65_v21, 0.0  ;;  %v77_v28 = vmax.f32 %v76_v22, 0.0 }
  0x31   :  { %v79_v29 = vmul.f32 %v78_v23, %v66_v27  ;;  %v81_v30 = vmul.f32 %v80_v24, %v77_v28  ;;  %v87_v31 = vmul.f32 %v86_v25, %v66_v27  ;;  %v89_v32 = vmul.f32 %v88_v26, %v77_v28 }
  0x33   :  { %v82_v35 = vadd.f32 %v81_v30, %v79_v29  ;;  %v90_v36 = vadd.f32 %v89_v32, %v87_v31 }
  0x35   :  { %v84_v37 = vadd.f32 %v83_v33, %v82_v35  ;;  %v92_v38 = vadd.f32 %v91_v34, %v90_v36 }
  0x37   :  { %85 = vst [vmem:[#allocation7] sm:$0xff] %v84_v37  ;;  %94 = vst [vmem:[#allocation7 + $0x8] sm:$0xff] %v92_v38 }
  0x38   :  { %174 = shalt.err (!%p171_p1)
}
  0x39   :  { %s175_s22 = scalar_lea.hbm %s261_s2, 256 }
  0x3a   :  { %p176_p2 = scmp.ne.s32.totalorder %s261_s2, %s175_s22  ;;  %p179_p3 = scmp.lt.u32.totalorder %s175_s22, %s261_s2 }
  0x3c   :  { %p181_p4 = pnand %p179_p3, %p176_p2 }
  0x3e   :  { %184 = shalt.err (!%p181_p4)
}
  0x3f   :  { %106 = dma.vmem_to_hbm [thread:$0]  %s101_s18, 256, %s261_s2, [#allocation4], %s193_s0, %s193_s0, %s194_s29  }
  0x40   :  { %189 = dma.done.wait [#allocation4], 256  }
  0x41   :  { %190 = vsyncadd [#allocation4], 4294967040 }
  0x42   :  { %110 = vsyncpa [#allocation3], 1 }
  0x43   :  { %111 = vsyncpa [#allocation4], 1 }
  0x44   :  { %112 = vsyncpa [#allocation5], 1 }

</bundles_post_ra>
